<compile_context>
chip_gen: v7x
topology: tpu7x:2x2x1
jax: 0.10.0
libtpu: 0.0.40
codegen_flags: <defaults>
</compile_context>

<pallas_src>
import math

import jax
import jax.numpy as jnp
from jax.experimental import pallas as pl
from jax.experimental.pallas import tpu as pltpu

_LANE_CANDIDATES = (512, 256, 128)   # lane-dense last-dim widths (multiples of 128)
_SMALL_TENSOR_BYTES = 256 * 1024     # below this, plain XLA is lower latency


def _sublane_multiple(dtype) -> int:
    """Packed sublane multiple for the dtype: 8 (f32), 16 (bf16/f16), 32 (int8/fp8)."""
    itemsize = jnp.dtype(dtype).itemsize
    return max(8, 32 // max(1, itemsize))


def _target_block_bytes() -> int:
    """Per-generation block-size budget (conservative on v5e's 16 MiB scoped VMEM)."""
    try:
        kind = jax.devices()[0].device_kind.lower()
    except Exception:  # pragma: no cover - be robust if device query fails
        return 2 * 1024 * 1024
    if ("v5 lite" in kind) or ("v5e" in kind) or ("v5lite" in kind):
        return 2 * 1024 * 1024
    return 4 * 1024 * 1024


def _pick_lanes(total: int):
    for lanes in _LANE_CANDIDATES:
        if total % lanes == 0:
            return lanes
    return None


def _choose_block_rows(rows: int, dtype, lanes: int, target_bytes: int) -> int:
    sub = _sublane_multiple(dtype)
    itemsize = jnp.dtype(dtype).itemsize
    cap = (target_bytes // (lanes * itemsize)) // sub * sub
    cap = max(sub, cap)
    # Keep at least 2 grid steps when there is enough work so the "parallel"
    # grid axis can be sharded across v7x's two TensorCores.
    half = ((rows + 1) // 2 + sub - 1) // sub * sub
    return max(sub, min(cap, half))


def _zero_mul_kernel(x_ref, o_ref):
    # Strict torch parity: reads x so NaN/Inf * 0.0 -> NaN, matching Tensor.mul(0.0).
    o_ref[...] = x_ref[...] * jnp.asarray(0.0, dtype=x_ref.dtype)


def _zero_fill_kernel(o_ref):
    # Write-only fill: no input stream at all (half the HBM bytes of the strict path).
    o_ref[...] = jnp.zeros(o_ref.shape, dtype=o_ref.dtype)


def _zero_mul_via_pallas(x: jax.Array) -> jax.Array:
    """x * 0.0 via a lane-dense, large-block Pallas kernel (strict NaN/Inf parity)."""
    shape, dtype = x.shape, x.dtype
    total = math.prod(shape)
    itemsize = jnp.dtype(dtype).itemsize
    lanes = _pick_lanes(total)

    if total == 0 or total * itemsize < _SMALL_TENSOR_BYTES or lanes is None:
        # Small-tensor / non-lane-divisible fallback: one fused XLA read+write
        # pass — identical HBM traffic to the kernel, no pad/slice passes.
        return x * jnp.asarray(0.0, dtype=dtype)

    rows = total // lanes
    x2 = x.reshape(rows, lanes)                    # free contiguous reshape
    block_rows = _choose_block_rows(rows, dtype, lanes, _target_block_bytes())
    grid = (pl.cdiv(rows, block_rows),)            # partial last block is masked

    out2 = pl.pallas_call(
        _zero_mul_kernel,
        out_shape=jax.ShapeDtypeStruct((rows, lanes), dtype),
        grid_spec=pltpu.PrefetchScalarGridSpec(
            num_scalar_prefetch=0,
            grid=grid,
            in_specs=[pl.BlockSpec((block_rows, lanes), lambda i: (i, 0))],
            out_specs=pl.BlockSpec((block_rows, lanes), lambda i: (i, 0)),
        ),
        compiler_params=pltpu.CompilerParams(dimension_semantics=("parallel",)),
        cost_estimate=pl.CostEstimate(
            flops=total, transcendentals=0, bytes_accessed=2 * total * itemsize
        ),
    )(x2)
    return out2.reshape(shape)


def _zeros_via_pallas(shape, dtype) -> jax.Array:
    """Write-only zeros of `shape` via a lane-dense Pallas fill kernel."""
    total = math.prod(shape)
    itemsize = jnp.dtype(dtype).itemsize
    lanes = _pick_lanes(total)

    if total == 0 or total * itemsize < _SMALL_TENSOR_BYTES or lanes is None:
        return jnp.zeros(shape, dtype=dtype)

    rows = total // lanes
    block_rows = _choose_block_rows(rows, dtype, lanes, _target_block_bytes())
    grid = (pl.cdiv(rows, block_rows),)

    out2 = pl.pallas_call(
        _zero_fill_kernel,
        out_shape=jax.ShapeDtypeStruct((rows, lanes), dtype),
        grid_spec=pltpu.PrefetchScalarGridSpec(
            num_scalar_prefetch=0,
            grid=grid,
            in_specs=[],
            out_specs=pl.BlockSpec((block_rows, lanes), lambda i: (i, 0)),
        ),
        compiler_params=pltpu.CompilerParams(dimension_semantics=("parallel",)),
        cost_estimate=pl.CostEstimate(
            flops=0, transcendentals=0, bytes_accessed=total * itemsize
        ),
    )()
    return out2.reshape(shape)


def zero_forward(x: jax.Array, stride: int, *, strict: bool = True) -> jax.Array:
    """Pallas equivalent of Zero(stride).forward(x). x is NCHW.

    strict=True  -> exact torch semantics (x.mul(0.0), NaN/Inf propagate).
    strict=False -> pure zero-fill (no input read, ~half the HBM traffic).
    """
    if stride != 1:
        if strict:
            # TODO(synk): fuse the ::stride subsample into the kernel via the
            # BlockSpec index_map instead of materializing it in XLA first.
            xs = x[:, :, ::stride, ::stride]
            return _zero_mul_via_pallas(xs)
        n, c, h, w = x.shape
        out_shape = (n, c, -(-h // stride), -(-w // stride))
        return _zeros_via_pallas(out_shape, x.dtype)

    if strict:
        return _zero_mul_via_pallas(x)
    return _zeros_via_pallas(x.shape, x.dtype)


if __name__ == "__main__":
    key = jax.random.PRNGKey(0)

    # Small NASNet-like shape (small-tensor fast path, both strides).
    x_small = jax.random.normal(key, (2, 4, 16, 16), dtype=jnp.float32)
    y1 = zero_forward(x_small, stride=1)
    y2 = zero_forward(x_small, stride=2)
    jax.block_until_ready((y1, y2))
    assert y1.shape == (2, 4, 16, 16) and y1.dtype == x_small.dtype
    assert y2.shape == (2, 4, 8, 8) and y2.dtype == x_small.dtype
    assert bool(jnp.all(y1 == 0.0)) and bool(jnp.all(y2 == 0.0))

    # Medium shape (512 KiB) that exercises the lane-dense Pallas kernels.
    x_med = jax.random.normal(jax.random.PRNGKey(0), (8, 16, 32, 32), dtype=jnp.float32)
    y3 = zero_forward(x_med, stride=1)                  # strict mul kernel
    y4 = zero_forward(x_med, stride=2)                  # strict, subsample + mul
    y5 = zero_forward(x_med, stride=1, strict=False)    # write-only fill kernel
    y6 = zero_forward(x_med, stride=2, strict=False)    # write-only, no gather
    jax.block_until_ready((y3, y4, y5, y6))
    assert y3.shape == x_med.shape and bool(jnp.all(y3 == 0.0))
    assert y4.shape == (8, 16, 16, 16) and bool(jnp.all(y4 == 0.0))
    assert y5.shape == x_med.shape and y5.dtype == x_med.dtype and bool(jnp.all(y5 == 0.0))
    assert y6.shape == (8, 16, 16, 16) and bool(jnp.all(y6 == 0.0))

    # NaN propagation matches torch.Tensor.mul(0.0) on the strict Pallas path.
    x_nan = x_med.at[0, 0, 0, 0].set(jnp.nan)
    y7 = zero_forward(x_nan, stride=1)
    jax.block_until_ready(y7)
    assert bool(jnp.isnan(y7[0, 0, 0, 0]))
    assert bool(jnp.all(y7[0, 0, 0, 1:] == 0.0))

    # Non-lane-divisible shape falls back to the fused XLA path; still correct.
    x_odd = jax.random.normal(jax.random.PRNGKey(0), (2, 3, 7, 7), dtype=jnp.float32)
    y8 = zero_forward(x_odd, stride=2)
    jax.block_until_ready(y8)
    assert y8.shape == (2, 3, 4, 4) and bool(jnp.all(y8 == 0.0))

    print("KERNEL_OK")
</pallas_src>

<mosaic_0001>
module attributes {stable_mosaic.version = 11 : i64} {
  func.func @_zero_mul_kernel(%arg0: i32, %arg1: memref<128x512xf32, #tpu.memory_space<vmem>>, %arg2: memref<128x512xf32, #tpu.memory_space<vmem>>) attributes {dimension_semantics = [#tpu.dimension_semantics<parallel>], iteration_bounds = array<i64: 2>, scalar_prefetch = 0 : i64, scratch_operands = 0 : i64, tpu.core_type = #tpu.core_type<tc>, window_params = [{transform_indices = @transform_0, window_bounds = array<i64: 128, 512>}, {transform_indices = @transform_1, window_bounds = array<i64: 128, 512>}]} {
    %c0 = arith.constant 0 : index
    %c0_0 = arith.constant 0 : index
    %0 = vector.load %arg1[%c0, %c0_0] : memref<128x512xf32, #tpu.memory_space<vmem>>, vector<128x512xf32>
    %cst = arith.constant 0.000000e+00 : f32
    %1 = vector.broadcast %cst : f32 to vector<128x512xf32>
    %2 = arith.mulf %0, %1 : vector<128x512xf32>
    %c0_1 = arith.constant 0 : index
    %c0_2 = arith.constant 0 : index
    %3 = vector.load %arg2[%c0_1, %c0_2] : memref<128x512xf32, #tpu.memory_space<vmem>>, vector<128x512xf32>
    tpu.vector_store %arg2[%c0_1, %c0_2], %2 {strides = array<i32>} : memref<128x512xf32, #tpu.memory_space<vmem>>, vector<128x512xf32>,
    return
  }
  func.func @transform_0(%arg0: i32) -> (i32, i32) {
    %c0_i32 = arith.constant 0 : i32
    %c0_i32_0 = arith.constant 0 : i32
    return %arg0, %c0_i32 : i32, i32
  }
  func.func @transform_1(%arg0: i32) -> (i32, i32) {
    %c0_i32 = arith.constant 0 : i32
    %c0_i32_0 = arith.constant 0 : i32
    return %arg0, %c0_i32 : i32, i32
  }
}

</mosaic_0001>

<bundles_post_ra>
// kernel: tpu_custom_call.1
= control target key start
LH: loop header
LB: loop body
LE: loop exit
PB: predicated region body
PF: predicated region fallthrough
CT: control target
= control target key end

     0   :  { %6 = vsyncpa [#allocation3], 0  ;;  %s901_s0 = inlined_call_operand.hbm [shape: f32[256,512], index: 0, kind: input, shape index: {}]   ;;  %s902_s1 = inlined_call_operand.hbm [shape: f32[256,512], index: 1, kind: output, shape index: {}]  }
   0x1   :  { %8 = vsyncpa [#allocation3 + $0x1], 0 }
   0x2   :  { %9 = vsyncpa [#allocation4], 0 }
   0x3   :  { %11 = vsyncpa [#allocation4 + $0x1], 0  ;;  %s602_s6 = smov 0   ;;  %s604_s7 = smov 0  }
   0x4   :  { %s606_s8 = smov 0   ;;  %s608_s9 = smov 0  }
   0x5 LB: > { %s623_s10 = sadd.s32 4294967295, %s584_s9   ;;  %s418_s11 = sadd.s32 4294967294, %s584_s9   ;;  %s584_s9 = sphi %s608_s9, %s915_s9   ;;  %s580_s8 = sphi %s606_s8, %s914_s8   ;;  %s576_s7 = sphi %s604_s7, %s913_s7   ;;  %s572_s6 = sphi %s602_s6, %s912_s6  }
   0x6   : > { %s627_s12 = sadd.s32 1, %s584_s9   ;;  %s24_s13 = sadd.s32 1, %s580_s8 }
   0x7   : > { %s21_s14 = ssub.s32 %s584_s9, %s627_s12  ;;  %p31_p0 = scmp.ne.s32.totalorder %s580_s8, %s576_s7 }
   0x8   : > { %p22_p1 = scmp.eq.s32.totalorder %s21_s14, 0  ;;  %p32_p2 = scmp.eq.s32.totalorder %s584_s9, 0 }
   0x9   : > { %p37_p3 = scmp.ne.s32.totalorder %s576_s7, %s572_s6  ;;  %p38_p4 = scmp.eq.s32.totalorder %s623_s10, 0 }
   0xa   : > { %s639_s15 = scalar_select %p22_p1, %s580_s8, %s24_s13  }
   0xb   : > { %p641_p5 = por %p32_p2, %p31_p0  ;;  %p645_p6 = por %p38_p4, %p37_p3 }
   0xc   : > { %p61_p7 = scmp.eq.s32.totalorder %s623_s10, 1  ;;  %p67_p8 = scmp.eq.s32.totalorder %s418_s11, 1 }
   0xd   : > { %p450_p10 = scmp.lt.s32.totalorder %s584_s9, 2  ;;  %s87_s20 = sand.u32 1, %s580_s8  }
   0xe   : > { %p652_p11 = por %p61_p7, %p31_p0  ;;  %p656_p12 = por %p67_p8, %p37_p3 }
   0xf   : > { %s435_s21 = sshll.u32 %s584_s9, 13  ;;  %s421_s22 = sshll.u32 %s87_s20, 9 }
  0x10   : > { %s906_s18 = scalar_select %p652_p11, 1, 0 }
  0x11   : > { %s907_s19 = scalar_select %p656_p12, 1, 0 }
  0x12   : > { %s665_s25 = scalar_lea.hbm %s901_s0, %s435_s21  ;;  %s91_s26 = scalar_lea.vmem [#allocation2], %s421_s22 }
  0x13   : > { %s99_s27 = sshll.u32 %s91_s26, 4  ;;  %p669_p13 = pnand %p450_p10, %p641_p5  ;;  %s673_s27 = int_to_ptr.vmem [resolvable:$true] %s99_s27 }
  0x14   : > { %s675_s29 = scalar_lea.sflag [#allocation3], %s87_s20  ;;  %s488_s30 = scalar_lea.hbm %s665_s25, 8192 }
  0x15   : > { %p489_p0 = scmp.ne.s32.totalorder %s665_s25, %s488_s30  ;;  %p490_p1 = pneg %p669_p13 }
  0x16   : > { %s493_s4 = scalar_lea.hbm %s901_s0, 16384  ;;  %p494_p4 = scmp.lt.u32.totalorder %s665_s25, %s901_s0 }
  0x17   : > { %p491_p2 = pnand %p490_p1, %p489_p0  ;;  %p495_p5 = scmp.lt.u32.totalorder %s493_s4, %s488_s30 }
  0x18   : > { %p497_p8 = scmp.lt.u32.totalorder %s488_s30, %s665_s25 }
  0x19   : > { %p492_p3 = pneg %p491_p2  ;;  %p496_p7 = por %p495_p5, %p494_p4 }
  0x1b   : > { %p498_p10 = por %p497_p8, %p496_p7 }
  0x1d   : > { %p499_p9 = pnand %p498_p10, %p492_p3 }
  0x1f   : > { %502 = shalt.err (!%p499_p9)
}
  0x20   : > { %s503_s13 = scalar_lea.vmem %s673_s27, 8192  ;;  %s586_s14 = smov [#allocation2]  }
  0x21   : > { %p504_p0 = scmp.ne.s32.totalorder %s673_s27, %s503_s13  ;;  %s508_s16 = sshll.u32 %s586_s14, 4  ;;  %s509_s16 = int_to_ptr.vmem [resolvable:$false] %s508_s16 }
  0x22   : > { %s510_s20 = scalar_lea.vmem %s509_s16, 16384  ;;  %p511_p11 = scmp.lt.s32.totalorder %s673_s27, %s509_s16 }
  0x23   : > { %p506_p2 = pnand %p504_p0, %p490_p1  ;;  %p512_p4 = scmp.lt.s32.totalorder %s510_s20, %s503_s13 }
  0x25   : > { %p507_p12 = pneg %p506_p2  ;;  %p513_p5 = por %p512_p4, %p511_p11 }
  0x27   : > { %p514_p7 = pnand %p513_p5, %p507_p12 }
  0x29   : > { %517 = shalt.err (!%p514_p7)
}
  0x2a   : > { %s587_s21 = smov 512   ;;  %s588_s22 = smov 32  }
  0x2b   : > { %445 = dma.hbm_to_vmem [thread:$0]  (!%p669_p13), %s665_s25, 8192, %s673_s27, %s675_s29, %s587_s21, %s587_s21, %s588_s22  }
  0x2c   : > { %p425_p9 = scmp.ge.s32.totalorder %s584_s9, 1  ;;  %p107_p1 = scmp.lt.s32.totalorder %s584_s9, 3 }
  0x2e   : > { %p108_p3 = pnand %p425_p9, %p107_p1 }
  0x2f   : > { %s706_s23 = sand.u32 (!%p108_p3), 1, %s576_s7  }
  0x30   : > { %111 = sbr.rel (%p108_p3) target bundleno = 112 (0x70), region = 24  ;;  %s426_s24 = sshll.u32 (!%p108_p3), %s706_s23, 9 }
  0x31   : > { %s114_s26 = scalar_lea.sflag (!%p108_p3), [#allocation3], %s706_s23  ;;  %s710_s30 = scalar_lea.vmem (!%p108_p3), [#allocation2], %s426_s24 }
  0x37   : > { %563 = dma.done.wait (%p645_p6), %s114_s26, 8192  }
  0x38   : > { %565 = vsyncadd (%p645_p6), %s114_s26, 4294959104  ;;  %v138_v0 = vld [vmem:[%s710_s30] sm:$0xff]  ;;  %v139_v1 = vld [vmem:[%s710_s30 + $0x8] sm:$0xff]  ;;  %s437_s25 = sshll.u32 %s623_s10, 13  ;;  %s720_s27 = scalar_lea.vmem [#allocation5], %s426_s24 }
  0x39   : > { %v140_v2 = vld [vmem:[%s710_s30 + $0x10] sm:$0xff]  ;;  %s345_s17 = sshll.u32 %s720_s27, 4  ;;  %v202_v3 = vmul.f32 0.0, %v138_v0  ;;  %v203_v4 = vmul.f32 0.0, %v139_v1  ;;  %v141_v6 = vld [vmem:[%s710_s30 + $0x18] sm:$0xff]  ;;  %v142_v7 = vld [vmem:[%s710_s30 + $0x20] sm:$0xff]  ;;  %s846_s2 = scalar_lea.hbm %s902_s1, %s437_s25  ;;  %s850_s17 = int_to_ptr.vmem [resolvable:$true] %s345_s17 }
  0x3a   : > { %v204_v5 = vmul.f32 0.0, %v140_v2  ;;  %v143_v8 = vld [vmem:[%s710_s30 + $0x28] sm:$0xff]  ;;  %v205_v9 = vmul.f32 0.0, %v141_v6  ;;  %v206_v10 = vmul.f32 0.0, %v142_v7  ;;  %v144_v12 = vld [vmem:[%s710_s30 + $0x30] sm:$0xff]  ;;  %v145_v13 = vld [vmem:[%s710_s30 + $0x38] sm:$0xff] }
  0x3b   : > { %v207_v11 = vmul.f32 0.0, %v143_v8  ;;  %v146_v14 = vld [vmem:[%s710_s30 + $0x40] sm:$0xff]  ;;  %266 = vst [vmem:[%s720_s27] sm:$0xff] %v202_v3  ;;  %267 = vst [vmem:[%s720_s27 + $0x8] sm:$0xff] %v203_v4  ;;  %v208_v15 = vmul.f32 0.0, %v144_v12  ;;  %v209_v16 = vmul.f32 0.0, %v145_v13  ;;  %v147_v18 = vld [vmem:[%s710_s30 + $0x48] sm:$0xff] }
  0x3c   : > { %268 = vst [vmem:[%s720_s27 + $0x10] sm:$0xff] %v204_v5  ;;  %v210_v17 = vmul.f32 0.0, %v146_v14  ;;  %v148_v19 = vld [vmem:[%s710_s30 + $0x50] sm:$0xff]  ;;  %v149_v20 = vld [vmem:[%s710_s30 + $0x58] sm:$0xff]  ;;  %269 = vst [vmem:[%s720_s27 + $0x18] sm:$0xff] %v205_v9  ;;  %v211_v21 = vmul.f32 0.0, %v147_v18 }
  0x3d   : > { %270 = vst [vmem:[%s720_s27 + $0x20] sm:$0xff] %v206_v10  ;;  %271 = vst [vmem:[%s720_s27 + $0x28] sm:$0xff] %v207_v11  ;;  %v212_v22 = vmul.f32 0.0, %v148_v19  ;;  %v213_v23 = vmul.f32 0.0, %v149_v20  ;;  %v150_v24 = vld [vmem:[%s710_s30 + $0x60] sm:$0xff]  ;;  %v151_v25 = vld [vmem:[%s710_s30 + $0x68] sm:$0xff] }
  0x3e   : > { %v152_v26 = vld [vmem:[%s710_s30 + $0x70] sm:$0xff]  ;;  %272 = vst [vmem:[%s720_s27 + $0x30] sm:$0xff] %v208_v15  ;;  %273 = vst [vmem:[%s720_s27 + $0x38] sm:$0xff] %v209_v16  ;;  %v214_v27 = vmul.f32 0.0, %v150_v24  ;;  %v215_v28 = vmul.f32 0.0, %v151_v25  ;;  %v153_v30 = vld [vmem:[%s710_s30 + $0x78] sm:$0xff] }
  0x3f   : > { %274 = vst [vmem:[%s720_s27 + $0x40] sm:$0xff] %v210_v17  ;;  %v216_v29 = vmul.f32 0.0, %v152_v26  ;;  %v154_v31 = vld [vmem:[%s710_s30 + $0x80] sm:$0xff]  ;;  %v155_v32 = vld [vmem:[%s710_s30 + $0x88] sm:$0xff]  ;;  %275 = vst [vmem:[%s720_s27 + $0x48] sm:$0xff] %v211_v21  ;;  %v217_v33 = vmul.f32 0.0, %v153_v30 }
  0x40   : > { %276 = vst [vmem:[%s720_s27 + $0x50] sm:$0xff] %v212_v22  ;;  %277 = vst [vmem:[%s720_s27 + $0x58] sm:$0xff] %v213_v23  ;;  %v218_v34 = vmul.f32 0.0, %v154_v31  ;;  %v219_v35 = vmul.f32 0.0, %v155_v32  ;;  %v156_v36 = vld [vmem:[%s710_s30 + $0x90] sm:$0xff]  ;;  %v157_v37 = vld [vmem:[%s710_s30 + $0x98] sm:$0xff] }
  0x41   : > { %v158_v38 = vld [vmem:[%s710_s30 + $0xa0] sm:$0xff]  ;;  %278 = vst [vmem:[%s720_s27 + $0x60] sm:$0xff] %v214_v27  ;;  %279 = vst [vmem:[%s720_s27 + $0x68] sm:$0xff] %v215_v28  ;;  %v220_v39 = vmul.f32 0.0, %v156_v36  ;;  %v221_v40 = vmul.f32 0.0, %v157_v37  ;;  %v159_v42 = vld [vmem:[%s710_s30 + $0xa8] sm:$0xff] }
  0x42   : > { %280 = vst [vmem:[%s720_s27 + $0x70] sm:$0xff] %v216_v29  ;;  %v222_v41 = vmul.f32 0.0, %v158_v38  ;;  %v160_v43 = vld [vmem:[%s710_s30 + $0xb0] sm:$0xff]  ;;  %v161_v44 = vld [vmem:[%s710_s30 + $0xb8] sm:$0xff]  ;;  %281 = vst [vmem:[%s720_s27 + $0x78] sm:$0xff] %v217_v33  ;;  %v223_v45 = vmul.f32 0.0, %v159_v42 }
  0x43   : > { %282 = vst [vmem:[%s720_s27 + $0x80] sm:$0xff] %v218_v34  ;;  %283 = vst [vmem:[%s720_s27 + $0x88] sm:$0xff] %v219_v35  ;;  %v224_v46 = vmul.f32 0.0, %v160_v43  ;;  %v225_v47 = vmul.f32 0.0, %v161_v44  ;;  %v162_v48 = vld [vmem:[%s710_s30 + $0xc0] sm:$0xff]  ;;  %v163_v49 = vld [vmem:[%s710_s30 + $0xc8] sm:$0xff] }
  0x44   : > { %v164_v50 = vld [vmem:[%s710_s30 + $0xd0] sm:$0xff]  ;;  %284 = vst [vmem:[%s720_s27 + $0x90] sm:$0xff] %v220_v39  ;;  %285 = vst [vmem:[%s720_s27 + $0x98] sm:$0xff] %v221_v40  ;;  %v226_v51 = vmul.f32 0.0, %v162_v48  ;;  %v227_v52 = vmul.f32 0.0, %v163_v49  ;;  %v165_v54 = vld [vmem:[%s710_s30 + $0xd8] sm:$0xff] }
  0x45   : > { %286 = vst [vmem:[%s720_s27 + $0xa0] sm:$0xff] %v222_v41  ;;  %v228_v53 = vmul.f32 0.0, %v164_v50  ;;  %v166_v55 = vld [vmem:[%s710_s30 + $0xe0] sm:$0xff]  ;;  %v167_v56 = vld [vmem:[%s710_s30 + $0xe8] sm:$0xff]  ;;  %287 = vst [vmem:[%s720_s27 + $0xa8] sm:$0xff] %v223_v45  ;;  %v229_v57 = vmul.f32 0.0, %v165_v54 }
  0x46   : > { %288 = vst [vmem:[%s720_s27 + $0xb0] sm:$0xff] %v224_v46  ;;  %289 = vst [vmem:[%s720_s27 + $0xb8] sm:$0xff] %v225_v47  ;;  %v230_v58 = vmul.f32 0.0, %v166_v55  ;;  %v231_v59 = vmul.f32 0.0, %v167_v56  ;;  %v168_v60 = vld [vmem:[%s710_s30 + $0xf0] sm:$0xff]  ;;  %v169_v61 = vld [vmem:[%s710_s30 + $0xf8] sm:$0xff] }
  0x47   : > { %v170_v62 = vld [vmem:[%s710_s30 + $0x100] sm:$0xff]  ;;  %290 = vst [vmem:[%s720_s27 + $0xc0] sm:$0xff] %v226_v51  ;;  %291 = vst [vmem:[%s720_s27 + $0xc8] sm:$0xff] %v227_v52  ;;  %v232_v63 = vmul.f32 0.0, %v168_v60  ;;  %v233_v0 = vmul.f32 0.0, %v169_v61  ;;  %v171_v2 = vld [vmem:[%s710_s30 + $0x108] sm:$0xff] }
  0x48   : > { %292 = vst [vmem:[%s720_s27 + $0xd0] sm:$0xff] %v228_v53  ;;  %v234_v1 = vmul.f32 0.0, %v170_v62  ;;  %v172_v3 = vld [vmem:[%s710_s30 + $0x110] sm:$0xff]  ;;  %v173_v4 = vld [vmem:[%s710_s30 + $0x118] sm:$0xff]  ;;  %293 = vst [vmem:[%s720_s27 + $0xd8] sm:$0xff] %v229_v57  ;;  %v235_v5 = vmul.f32 0.0, %v171_v2 }
  0x49   : > { %294 = vst [vmem:[%s720_s27 + $0xe0] sm:$0xff] %v230_v58  ;;  %295 = vst [vmem:[%s720_s27 + $0xe8] sm:$0xff] %v231_v59  ;;  %v236_v6 = vmul.f32 0.0, %v172_v3  ;;  %v237_v7 = vmul.f32 0.0, %v173_v4  ;;  %v174_v8 = vld [vmem:[%s710_s30 + $0x120] sm:$0xff]  ;;  %v175_v9 = vld [vmem:[%s710_s30 + $0x128] sm:$0xff] }
  0x4a   : > { %v176_v10 = vld [vmem:[%s710_s30 + $0x130] sm:$0xff]  ;;  %296 = vst [vmem:[%s720_s27 + $0xf0] sm:$0xff] %v232_v63  ;;  %297 = vst [vmem:[%s720_s27 + $0xf8] sm:$0xff] %v233_v0  ;;  %v238_v11 = vmul.f32 0.0, %v174_v8  ;;  %v239_v12 = vmul.f32 0.0, %v175_v9  ;;  %v177_v14 = vld [vmem:[%s710_s30 + $0x138] sm:$0xff] }
  0x4b   : > { %298 = vst [vmem:[%s720_s27 + $0x100] sm:$0xff] %v234_v1  ;;  %v240_v13 = vmul.f32 0.0, %v176_v10  ;;  %v178_v15 = vld [vmem:[%s710_s30 + $0x140] sm:$0xff]  ;;  %v179_v16 = vld [vmem:[%s710_s30 + $0x148] sm:$0xff]  ;;  %299 = vst [vmem:[%s720_s27 + $0x108] sm:$0xff] %v235_v5  ;;  %v241_v17 = vmul.f32 0.0, %v177_v14 }
  0x4c   : > { %300 = vst [vmem:[%s720_s27 + $0x110] sm:$0xff] %v236_v6  ;;  %301 = vst [vmem:[%s720_s27 + $0x118] sm:$0xff] %v237_v7  ;;  %v242_v18 = vmul.f32 0.0, %v178_v15  ;;  %v243_v19 = vmul.f32 0.0, %v179_v16  ;;  %v180_v20 = vld [vmem:[%s710_s30 + $0x150] sm:$0xff]  ;;  %v181_v21 = vld [vmem:[%s710_s30 + $0x158] sm:$0xff] }
  0x4d   : > { %v182_v22 = vld [vmem:[%s710_s30 + $0x160] sm:$0xff]  ;;  %302 = vst [vmem:[%s720_s27 + $0x120] sm:$0xff] %v238_v11  ;;  %303 = vst [vmem:[%s720_s27 + $0x128] sm:$0xff] %v239_v12  ;;  %v244_v23 = vmul.f32 0.0, %v180_v20  ;;  %v245_v24 = vmul.f32 0.0, %v181_v21  ;;  %v183_v26 = vld [vmem:[%s710_s30 + $0x168] sm:$0xff] }
  0x4e   : > { %304 = vst [vmem:[%s720_s27 + $0x130] sm:$0xff] %v240_v13  ;;  %v246_v25 = vmul.f32 0.0, %v182_v22  ;;  %v184_v27 = vld [vmem:[%s710_s30 + $0x170] sm:$0xff]  ;;  %v185_v28 = vld [vmem:[%s710_s30 + $0x178] sm:$0xff]  ;;  %305 = vst [vmem:[%s720_s27 + $0x138] sm:$0xff] %v241_v17  ;;  %v247_v29 = vmul.f32 0.0, %v183_v26 }
  0x4f   : > { %306 = vst [vmem:[%s720_s27 + $0x140] sm:$0xff] %v242_v18  ;;  %307 = vst [vmem:[%s720_s27 + $0x148] sm:$0xff] %v243_v19  ;;  %v248_v30 = vmul.f32 0.0, %v184_v27  ;;  %v249_v31 = vmul.f32 0.0, %v185_v28  ;;  %v186_v32 = vld [vmem:[%s710_s30 + $0x180] sm:$0xff]  ;;  %v187_v33 = vld [vmem:[%s710_s30 + $0x188] sm:$0xff] }
  0x50   : > { %v188_v34 = vld [vmem:[%s710_s30 + $0x190] sm:$0xff]  ;;  %308 = vst [vmem:[%s720_s27 + $0x150] sm:$0xff] %v244_v23  ;;  %309 = vst [vmem:[%s720_s27 + $0x158] sm:$0xff] %v245_v24  ;;  %v250_v35 = vmul.f32 0.0, %v186_v32  ;;  %v251_v36 = vmul.f32 0.0, %v187_v33  ;;  %v189_v38 = vld [vmem:[%s710_s30 + $0x198] sm:$0xff] }
  0x51   : > { %310 = vst [vmem:[%s720_s27 + $0x160] sm:$0xff] %v246_v25  ;;  %v252_v37 = vmul.f32 0.0, %v188_v34  ;;  %v190_v39 = vld [vmem:[%s710_s30 + $0x1a0] sm:$0xff]  ;;  %v191_v40 = vld [vmem:[%s710_s30 + $0x1a8] sm:$0xff]  ;;  %311 = vst [vmem:[%s720_s27 + $0x168] sm:$0xff] %v247_v29  ;;  %v253_v41 = vmul.f32 0.0, %v189_v38 }
  0x52   : > { %312 = vst [vmem:[%s720_s27 + $0x170] sm:$0xff] %v248_v30  ;;  %313 = vst [vmem:[%s720_s27 + $0x178] sm:$0xff] %v249_v31  ;;  %v254_v42 = vmul.f32 0.0, %v190_v39  ;;  %v255_v43 = vmul.f32 0.0, %v191_v40  ;;  %v192_v44 = vld [vmem:[%s710_s30 + $0x1b0] sm:$0xff]  ;;  %v193_v45 = vld [vmem:[%s710_s30 + $0x1b8] sm:$0xff] }
  0x53   : > { %v194_v46 = vld [vmem:[%s710_s30 + $0x1c0] sm:$0xff]  ;;  %314 = vst [vmem:[%s720_s27 + $0x180] sm:$0xff] %v250_v35  ;;  %315 = vst [vmem:[%s720_s27 + $0x188] sm:$0xff] %v251_v36  ;;  %v256_v47 = vmul.f32 0.0, %v192_v44  ;;  %v257_v48 = vmul.f32 0.0, %v193_v45  ;;  %v195_v50 = vld [vmem:[%s710_s30 + $0x1c8] sm:$0xff] }
  0x54   : > { %316 = vst [vmem:[%s720_s27 + $0x190] sm:$0xff] %v252_v37  ;;  %v258_v49 = vmul.f32 0.0, %v194_v46  ;;  %v196_v51 = vld [vmem:[%s710_s30 + $0x1d0] sm:$0xff]  ;;  %v197_v52 = vld [vmem:[%s710_s30 + $0x1d8] sm:$0xff]  ;;  %317 = vst [vmem:[%s720_s27 + $0x198] sm:$0xff] %v253_v41  ;;  %v259_v53 = vmul.f32 0.0, %v195_v50 }
  0x55   : > { %318 = vst [vmem:[%s720_s27 + $0x1a0] sm:$0xff] %v254_v42  ;;  %319 = vst [vmem:[%s720_s27 + $0x1a8] sm:$0xff] %v255_v43  ;;  %v260_v54 = vmul.f32 0.0, %v196_v51  ;;  %v261_v55 = vmul.f32 0.0, %v197_v52  ;;  %v198_v56 = vld [vmem:[%s710_s30 + $0x1e0] sm:$0xff]  ;;  %v199_v57 = vld [vmem:[%s710_s30 + $0x1e8] sm:$0xff] }
  0x56   : > { %v200_v58 = vld [vmem:[%s710_s30 + $0x1f0] sm:$0xff]  ;;  %320 = vst [vmem:[%s720_s27 + $0x1b0] sm:$0xff] %v256_v47  ;;  %321 = vst [vmem:[%s720_s27 + $0x1b8] sm:$0xff] %v257_v48  ;;  %v262_v59 = vmul.f32 0.0, %v198_v56  ;;  %v263_v60 = vmul.f32 0.0, %v199_v57  ;;  %v201_v62 = vld [vmem:[%s710_s30 + $0x1f8] sm:$0xff] }
  0x57   : > { %322 = vst [vmem:[%s720_s27 + $0x1c0] sm:$0xff] %v258_v49  ;;  %v264_v61 = vmul.f32 0.0, %v200_v58  ;;  %323 = vst [vmem:[%s720_s27 + $0x1c8] sm:$0xff] %v259_v53  ;;  %v265_v63 = vmul.f32 0.0, %v201_v62  ;;  %s331_s10 = scalar_lea.sflag [#allocation4], %s706_s23  ;;  %s518_s3 = scalar_lea.vmem %s850_s17, 8192 }
  0x58   : > { %324 = vst [vmem:[%s720_s27 + $0x1d0] sm:$0xff] %v260_v54  ;;  %325 = vst [vmem:[%s720_s27 + $0x1d8] sm:$0xff] %v261_v55  ;;  %p519_p6 = scmp.ne.s32.totalorder %s850_s17, %s518_s3  ;;  %p909_p11 = scmp.ne.s32.totalorder %s906_s18, 0 }
  0x59   : > { %326 = vst [vmem:[%s720_s27 + $0x1e0] sm:$0xff] %v262_v59  ;;  %327 = vst [vmem:[%s720_s27 + $0x1e8] sm:$0xff] %v263_v60  ;;  %s589_s4 = smov [#allocation5]  }
  0x5a   : > { %328 = vst [vmem:[%s720_s27 + $0x1f0] sm:$0xff] %v264_v61  ;;  %329 = vst [vmem:[%s720_s27 + $0x1f8] sm:$0xff] %v265_v63  ;;  %p520_p12 = pnand %p519_p6, %p909_p11  ;;  %s522_s5 = sshll.u32 %s589_s4, 4  ;;  %s523_s5 = int_to_ptr.vmem [resolvable:$false] %s522_s5 }
  0x5b   : > { %s524_s11 = scalar_lea.vmem %s523_s5, 16384  ;;  %p525_p8 = scmp.lt.s32.totalorder %s850_s17, %s523_s5 }
  0x5c   : > { %p521_p13 = pneg %p520_p12  ;;  %p526_p10 = scmp.lt.s32.totalorder %s524_s11, %s518_s3 }
  0x5e   : > { %p527_p0 = por %p526_p10, %p525_p8 }
  0x60   : > { %p528_p2 = pnand %p527_p0, %p521_p13 }
  0x62   : > { %531 = shalt.err (!%p528_p2)
}
  0x63   : > { %s532_s13 = scalar_lea.hbm %s846_s2, 8192  ;;  %s536_s20 = scalar_lea.hbm %s902_s1, 16384 }
  0x64   : > { %p533_p4 = scmp.ne.s32.totalorder %s846_s2, %s532_s13  ;;  %p537_p9 = scmp.lt.u32.totalorder %s846_s2, %s902_s1 }
  0x65   : > { %p538_p1 = scmp.lt.u32.totalorder %s536_s20, %s532_s13  ;;  %p540_p6 = scmp.lt.u32.totalorder %s532_s13, %s846_s2 }
  0x66   : > { %p534_p5 = pnand %p533_p4, %p909_p11 }
  0x67   : > { %p539_p3 = por %p538_p1, %p537_p9 }
  0x68   : > { %p535_p7 = pneg %p534_p5 }
  0x69   : > { %p541_p12 = por %p540_p6, %p539_p3 }
  0x6b   : > { %p542_p13 = pnand %p541_p12, %p535_p7 }
  0x6d   : > { %545 = shalt.err (!%p542_p13)
}
  0x6e   : > { %s590_s24 = smov 512   ;;  %s591_s26 = smov 32  }
  0x6f   : > { %440 = dma.vmem_to_hbm [thread:$0]  (%p909_p11), %s850_s17, 8192, %s846_s2, %s331_s10, %s590_s24, %s590_s24, %s591_s26  }
  0x70 PF: > { %s360_s30 = sand.u32 1, %s572_s6   ;;  %p910_p8 = scmp.ne.s32.totalorder %s907_s19, 0 }
  0x71   : > { %p911_p10 = scmp.ge.s32.totalorder %s584_s9, 2  ;;  %s361_s25 = scalar_lea.sflag [#allocation4], %s360_s30 }
  0x73   : > { %p447_p0 = pnand %p911_p10, %p910_p8 }
  0x75   : > { %567 = dma.done.wait (!%p447_p0), %s361_s25, 8192  }
  0x76   : > { %569 = vsyncadd (!%p447_p0), %s361_s25, 4294959104  ;;  %p14_p2 = scmp.ge.s32.totalorder %s627_s12, 4   ;;  %s912_s6 = smov %s576_s7 }
  0x77   : > { %s913_s7 = smov %s580_s8  ;;  %s914_s8 = smov %s639_s15 }
  0x78   : > { %s915_s9 = smov %s627_s12  ;;  %16 = sbr.rel (!%p14_p2) target bundleno = 5 (0x5), region = 69 }
  0x7f   :  { %366 = vsyncpa [#allocation3], 1 }
  0x80   :  { %368 = vsyncpa [#allocation3 + $0x1], 1 }
  0x81   :  { %369 = vsyncpa [#allocation4], 1 }
  0x82   :  { %371 = vsyncpa [#allocation4 + $0x1], 1 }

</bundles_post_ra>
